<compile_context>
chip_gen: v7x
topology: tpu7x:2x2x1
jax: 0.10.0
libtpu: 0.0.40
codegen_flags: <defaults>
</compile_context>

<pallas_src>
import functools

import jax
import jax.numpy as jnp
from jax import lax
from jax.experimental import pallas as pl
from jax.experimental.pallas import tpu as pltpu


def _round_up(v, m):
    return -(-v // m) * m


def _focal_cosine_kernel(x_ref, t_ref, o_ref, acc_ref, *,
                         coef, gamma, n_total, tile_n, tiles_per_shard):
    p = pl.program_id(0)          # core shard (parallel axis)
    i = pl.program_id(1)          # batch tile within the shard (arbitrary axis)

    @pl.when(i == 0)
    def _():
        acc_ref[...] = jnp.zeros_like(acc_ref)

    x = x_ref[...].astype(jnp.float32)          # (TN, C)
    t = t_ref[...]                              # (TN, 1) int32
    tn, c = x.shape

    # Logical (unclamped) global tile index.  Rows past the true batch (the
    # duplicate tile created by 2-way sharding of an odd tile count, and the
    # padded tail of the last partial tile) are dropped via `valid` below.
    g = p * tiles_per_shard + i
    row = lax.broadcasted_iota(jnp.int32, (tn, 1), 0)
    valid = (g * tile_n + row) < n_total        # (TN, 1) bool

    eps = 1e-12  # F.normalize / cosine-similarity eps

    # Target logit via iota-compare (no one-hot tensor, single row-reduce).
    col = lax.broadcasted_iota(jnp.int32, (tn, c), 1)
    dot = jnp.sum(jnp.where(col == t, x, 0.0), axis=-1, keepdims=True)  # x[tgt]
    sq = jnp.sum(x * x, axis=-1, keepdims=True)                         # ||x||^2

    # ---- cosine embedding loss term (y = +1, ||one_hot|| = 1) ----
    cos_term = 1.0 - dot * lax.rsqrt((sq + eps) * (1.0 + eps))          # (TN,1)

    # ---- focal loss on cross entropy of F.normalize(x) ----
    inv_norm = lax.rsqrt(jnp.maximum(sq, eps * eps))   # == 1 / max(||x||, eps)
    xn = x * inv_norm                                  # rows have |xn| <= 1
    # |xn| <= 1  =>  exp cannot overflow: skip the usual max-subtraction
    # (removes one (TN,C) cross-lane max and one (TN,C) subtract per tile).
    lse = jnp.log(jnp.sum(jnp.exp(xn), axis=-1, keepdims=True))
    cent = lse - dot * inv_norm                        # per-sample CE (TN,1)
    pt = jnp.exp(-cent)
    w = jnp.maximum(1.0 - pt, 0.0)                     # clamp: robust pow base
    if float(gamma) == 2.0:
        wg = w * w
    elif float(gamma) == 1.0:
        wg = w
    else:
        wg = w ** gamma

    # coef = alpha * xent (folded at trace time).  Invalid rows (garbage /
    # NaN/Inf from unread padding) are selected out here; every reduction
    # above is per-row (axis=-1) so they cannot contaminate valid rows.
    per_row = jnp.where(valid, cos_term + coef * wg * cent, 0.0)
    acc_ref[...] += jnp.sum(per_row, axis=0, keepdims=True)

    @pl.when(i == pl.num_programs(1) - 1)
    def _():
        # Lane-dense (8,128) slab write; every element carries this shard's
        # partial sum.  Collapsed to scalar (sum over shards / N) in JAX.
        o_ref[...] = acc_ref[...] + jnp.zeros((1, 8, 128), jnp.float32)


def focal_cosine_loss(x, target, *, alpha=1.0, gamma=2.0, xent=0.1,
                      max_tile_n=4096, vmem_budget_bytes=24 << 20):
    """x: (N, C) float logits (f32 or bf16); target: (N,) ints. Returns f32 scalar."""
    n, c = x.shape
    t2d = target.astype(jnp.int32).reshape(n, 1)
    itemsize = x.dtype.itemsize

    # VMEM-budget-aware tile size: double-buffered x tile (lanes padded to a
    # multiple of 128) + double-buffered lane-padded (tn,1) int32 target block.
    c_pad = _round_up(c, 128)
    bytes_per_row = 2 * (c_pad * itemsize + 128 * 4)
    tn_budget = max(16, (vmem_budget_bytes // bytes_per_row) // 16 * 16)
    tn_cap = max(16, min((int(max_tile_n) // 16) * 16, tn_budget))

    if n <= tn_cap:            # single full-batch tile (full-dim block is exempt
        tn, num_tiles = n, 1   # from the 8-divisibility rule)
    else:                      # tn is a multiple of 16 (works for f32 and bf16)
        tn, num_tiles = tn_cap, -(-n // tn_cap)

    # Shard the batch across 2 TensorCores (v7x megacore); on v5e/v6e this is
    # just a harmless serial split.  Each shard owns its own accumulator
    # scratch and output slab.
    num_shards = 2 if num_tiles >= 2 else 1
    tiles_per_shard = -(-num_tiles // num_shards)

    footprint = tn * bytes_per_row                  # double-buffered streams
    vmem_limit = int(min(max(footprint + (6 << 20), 16 << 20), 48 << 20))

    kernel = functools.partial(
        _focal_cosine_kernel, coef=float(alpha) * float(xent),
        gamma=float(gamma), n_total=n, tile_n=tn,
        tiles_per_shard=tiles_per_shard)

    def _in_map(p, i):
        # Clamp so a shard's trailing duplicate tile never indexes past the
        # array; its rows are masked out inside the kernel.
        return (jnp.minimum(p * tiles_per_shard + i, num_tiles - 1), 0)

    cost = pl.CostEstimate(
        flops=8 * n * c,
        transcendentals=n * c + 4 * n,
        bytes_accessed=n * c * itemsize + n * 4 + num_shards * 8 * 128 * 4)

    out = pl.pallas_call(
        kernel,
        out_shape=jax.ShapeDtypeStruct((num_shards, 8, 128), jnp.float32),
        grid=(num_shards, tiles_per_shard),
        in_specs=[
            pl.BlockSpec((tn, c), _in_map),
            pl.BlockSpec((tn, 1), _in_map),
        ],
        out_specs=pl.BlockSpec((1, 8, 128), lambda p, i: (p, 0, 0)),
        scratch_shapes=[pltpu.VMEM((1, 1), jnp.float32)],
        compiler_params=pltpu.CompilerParams(
            dimension_semantics=("parallel", "arbitrary"),
            vmem_limit_bytes=vmem_limit),
        cost_estimate=cost,
    )(x, t2d)

    return jnp.sum(out[:, 0, 0]) / n


def _reference(x, target, alpha=1.0, gamma=2.0, xent=0.1):
    # pure-JAX reference mirroring the PyTorch forward (reduction='mean')
    n, c = x.shape
    x = x.astype(jnp.float32)
    onehot = jax.nn.one_hot(target, c, dtype=jnp.float32)
    eps = 1e-12
    dot = jnp.sum(x * onehot, axis=-1)
    sq = jnp.sum(x * x, axis=-1)
    cos = dot / jnp.sqrt((sq + eps) * (1.0 + eps))
    cosine_loss = jnp.mean(1.0 - cos)
    xn = x / jnp.maximum(jnp.sqrt(sq), eps)[:, None]
    logp = jax.nn.log_softmax(xn, axis=-1)
    cent = -jnp.take_along_axis(logp, target[:, None], axis=-1)[:, 0]
    pt = jnp.exp(-cent)
    focal = jnp.mean(alpha * (1.0 - pt) ** gamma * cent)
    return cosine_loss + xent * focal


if __name__ == "__main__":
    key = jax.random.PRNGKey(0)
    k1, k2, k3, k4 = jax.random.split(key, 4)

    # Small single-tile case.
    N, C = 8, 32
    x = jax.random.normal(k1, (N, C), dtype=jnp.float32)
    target = jax.random.randint(k2, (N,), 0, C, dtype=jnp.int32)
    out = jax.block_until_ready(focal_cosine_loss(x, target, alpha=1.0,
                                                  gamma=2.0, xent=0.1))
    ref = _reference(x, target)
    assert jnp.allclose(out, ref, atol=1e-5, rtol=1e-5), (out, ref)

    # Multi-tile + 2-shard split + clamped duplicate tile + masked partial
    # last tile (N % tn != 0, N % 8 != 0, C not a multiple of 128).
    N2, C2 = 1030, 130
    x2 = jax.random.normal(k3, (N2, C2), dtype=jnp.float32)
    target2 = jax.random.randint(k4, (N2,), 0, C2, dtype=jnp.int32)
    out2 = jax.block_until_ready(
        focal_cosine_loss(x2, target2, max_tile_n=128))
    ref2 = _reference(x2, target2)
    assert jnp.allclose(out2, ref2, atol=2e-5, rtol=2e-5), (out2, ref2)

    # bf16 logits streamed directly (no wrapper upcast); math is f32 in-kernel.
    x3 = x2.astype(jnp.bfloat16)
    out3 = jax.block_until_ready(
        focal_cosine_loss(x3, target2, max_tile_n=256))
    ref3 = _reference(x3.astype(jnp.float32), target2)
    assert jnp.allclose(out3, ref3, atol=2e-5, rtol=2e-5), (out3, ref3)

    print("KERNEL_OK")
</pallas_src>

<mosaic_0001>
module attributes {stable_mosaic.version = 11 : i64} {
  func.func @_focal_cosine_kernel(%arg0: i32, %arg1: i32, %arg2: memref<8x32xf32, #tpu.memory_space<vmem>>, %arg3: memref<8x1xi32, #tpu.memory_space<vmem>>, %arg4: memref<1x8x128xf32, #tpu.memory_space<vmem>>, %arg5: memref<1x1xf32, #tpu.memory_space<vmem>>) attributes {dimension_semantics = [#tpu.dimension_semantics<parallel>, #tpu.dimension_semantics<arbitrary>], iteration_bounds = array<i64: 1, 1>, scalar_prefetch = 0 : i64, scratch_operands = 1 : i64, tpu.core_type = #tpu.core_type<tc>, window_params = [{transform_indices = @transform_0, window_bounds = array<i64: 8, 32>}, {transform_indices = @transform_1, window_bounds = array<i64: 8, 1>}, {transform_indices = @transform_2, window_bounds = array<i64: 1, 8, 128>}]} {
    %c0_i32 = arith.constant 0 : i32
    %0 = arith.cmpi eq, %arg1, %c0_i32 : i32
    %1 = arith.extui %0 : i1 to i32
    %c0_i32_0 = arith.constant 0 : i32
    %2 = arith.cmpi ne, %1, %c0_i32_0 : i32
    scf.if %2 {
      %cst_24 = arith.constant 0.000000e+00 : f32
      %64 = vector.broadcast %cst_24 : f32 to vector<1x1xf32>
      %c0_25 = arith.constant 0 : index
      %c0_26 = arith.constant 0 : index
      %65 = vector.load %arg5[%c0_25, %c0_26] : memref<1x1xf32, #tpu.memory_space<vmem>>, vector<1x1xf32>
      tpu.vector_store %arg5[%c0_25, %c0_26], %64 {strides = array<i32>} : memref<1x1xf32, #tpu.memory_space<vmem>>, vector<1x1xf32>,
    } else {
    }
    %c0 = arith.constant 0 : index
    %c0_1 = arith.constant 0 : index
    %3 = vector.load %arg2[%c0, %c0_1] : memref<8x32xf32, #tpu.memory_space<vmem>>, vector<8x32xf32>
    %c0_2 = arith.constant 0 : index
    %c0_3 = arith.constant 0 : index
    %4 = vector.load %arg3[%c0_2, %c0_3] : memref<8x1xi32, #tpu.memory_space<vmem>>, vector<8x1xi32>
    %c1_i32 = arith.constant 1 : i32
    %5 = arith.muli %arg0, %c1_i32 : i32
    %6 = arith.addi %5, %arg1 : i32
    %7 = tpu.iota {dimensions = array<i32: 0>} : vector<8x1xi32>
    %c8_i32 = arith.constant 8 : i32
    %8 = arith.muli %6, %c8_i32 : i32
    %9 = vector.broadcast %8 : i32 to vector<8x1xi32>
    %10 = arith.addi %9, %7 : vector<8x1xi32>
    %c8_i32_4 = arith.constant 8 : i32
    %11 = vector.broadcast %c8_i32_4 : i32 to vector<8x1xi32>
    %12 = arith.cmpi slt, %10, %11 : vector<8x1xi32>
    %13 = tpu.iota {dimensions = array<i32: 1>} : vector<8x32xi32>
    %14 = vector.broadcast %4 : vector<8x1xi32> to vector<8x32xi32>
    %15 = arith.cmpi eq, %13, %14 : vector<8x32xi32>
    %cst = arith.constant 0.000000e+00 : f32
    %16 = vector.broadcast %cst : f32 to vector<8x32xf32>
    %17 = arith.select %15, %3, %16 : vector<8x32xi1>, vector<8x32xf32>
    %cst_5 = arith.constant dense<0.000000e+00> : vector<8xf32>
    %18 = vector.multi_reduction <add>, %17, %cst_5 [1] : vector<8x32xf32> to vector<8xf32>
    %19 = vector.shape_cast %18 : vector<8xf32> to vector<8x1xf32>
    %20 = arith.mulf %3, %3 : vector<8x32xf32>
    %cst_6 = arith.constant dense<0.000000e+00> : vector<8xf32>
    %21 = vector.multi_reduction <add>, %20, %cst_6 [1] : vector<8x32xf32> to vector<8xf32>
    %22 = vector.shape_cast %21 : vector<8xf32> to vector<8x1xf32>
    %cst_7 = arith.constant 9.99999996E-13 : f32
    %23 = vector.broadcast %cst_7 : f32 to vector<8x1xf32>
    %24 = arith.addf %22, %23 : vector<8x1xf32>
    %cst_8 = arith.constant 1.000000e+00 : f32
    %25 = vector.broadcast %cst_8 : f32 to vector<8x1xf32>
    %26 = arith.mulf %24, %25 : vector<8x1xf32>
    %27 = math.rsqrt %26 : vector<8x1xf32>
    %28 = arith.mulf %19, %27 : vector<8x1xf32>
    %cst_9 = arith.constant 1.000000e+00 : f32
    %29 = vector.broadcast %cst_9 : f32 to vector<8x1xf32>
    %30 = arith.subf %29, %28 : vector<8x1xf32>
    %cst_10 = arith.constant 1.000000e-24 : f32
    %31 = vector.broadcast %cst_10 : f32 to vector<8x1xf32>
    %32 = arith.maximumf %22, %31 : vector<8x1xf32>
    %33 = math.rsqrt %32 : vector<8x1xf32>
    %34 = vector.broadcast %33 : vector<8x1xf32> to vector<8x32xf32>
    %35 = arith.mulf %3, %34 : vector<8x32xf32>
    %36 = math.exp %35 : vector<8x32xf32>
    %cst_11 = arith.constant dense<0.000000e+00> : vector<8xf32>
    %37 = vector.multi_reduction <add>, %36, %cst_11 [1] : vector<8x32xf32> to vector<8xf32>
    %38 = vector.shape_cast %37 : vector<8xf32> to vector<8x1xf32>
    %39 = math.log %38 : vector<8x1xf32>
    %40 = arith.mulf %19, %33 : vector<8x1xf32>
    %41 = arith.subf %39, %40 : vector<8x1xf32>
    %cst_12 = arith.constant 0.000000e+00 : f32
    %42 = vector.broadcast %cst_12 : f32 to vector<8x1xf32>
    %43 = arith.subf %42, %41 : vector<8x1xf32>
    %44 = math.exp %43 : vector<8x1xf32>
    %cst_13 = arith.constant 1.000000e+00 : f32
    %45 = vector.broadcast %cst_13 : f32 to vector<8x1xf32>
    %46 = arith.subf %45, %44 : vector<8x1xf32>
    %cst_14 = arith.constant 0.000000e+00 : f32
    %47 = vector.broadcast %cst_14 : f32 to vector<8x1xf32>
    %48 = arith.maximumf %46, %47 : vector<8x1xf32>
    %49 = arith.mulf %48, %48 : vector<8x1xf32>
    %cst_15 = arith.constant 1.000000e-01 : f32
    %50 = vector.broadcast %cst_15 : f32 to vector<8x1xf32>
    %51 = arith.mulf %50, %49 : vector<8x1xf32>
    %52 = arith.mulf %51, %41 : vector<8x1xf32>
    %53 = arith.addf %30, %52 : vector<8x1xf32>
    %cst_16 = arith.constant 0.000000e+00 : f32
    %54 = vector.broadcast %cst_16 : f32 to vector<8x1xf32>
    %55 = arith.select %12, %53, %54 : vector<8x1xi1>, vector<8x1xf32>
    %c0_17 = arith.constant 0 : index
    %c0_18 = arith.constant 0 : index
    %56 = vector.load %arg5[%c0_17, %c0_18] : memref<1x1xf32, #tpu.memory_space<vmem>>, vector<1x1xf32>
    %cst_19 = arith.constant dense<0.000000e+00> : vector<1xf32>
    %57 = vector.multi_reduction <add>, %55, %cst_19 [0] : vector<8x1xf32> to vector<1xf32>
    %58 = vector.shape_cast %57 : vector<1xf32> to vector<1x1xf32>
    %59 = arith.addf %56, %58 : vector<1x1xf32>
    %c0_20 = arith.constant 0 : index
    %c0_21 = arith.constant 0 : index
    %60 = vector.load %arg5[%c0_20, %c0_21] : memref<1x1xf32, #tpu.memory_space<vmem>>, vector<1x1xf32>
    tpu.vector_store %arg5[%c0_20, %c0_21], %59 {strides = array<i32>} : memref<1x1xf32, #tpu.memory_space<vmem>>, vector<1x1xf32>,
    %c0_i32_22 = arith.constant 0 : i32
    %61 = arith.cmpi eq, %arg1, %c0_i32_22 : i32
    %62 = arith.extui %61 : i1 to i32
    %c0_i32_23 = arith.constant 0 : i32
    %63 = arith.cmpi ne, %62, %c0_i32_23 : i32
    scf.if %63 {
      %c0_24 = arith.constant 0 : index
      %c0_25 = arith.constant 0 : index
      %64 = vector.load %arg5[%c0_24, %c0_25] : memref<1x1xf32, #tpu.memory_space<vmem>>, vector<1x1xf32>
      %cst_26 = arith.constant 0.000000e+00 : f32
      %65 = vector.broadcast %cst_26 : f32 to vector<1x8x128xf32>
      %66 = vector.shape_cast %64 : vector<1x1xf32> to vector<1x1x1xf32>
      %67 = vector.broadcast %66 : vector<1x1x1xf32> to vector<1x8x128xf32>
      %68 = arith.addf %67, %65 : vector<1x8x128xf32>
      %c0_27 = arith.constant 0 : index
      %c0_28 = arith.constant 0 : index
      %c0_29 = arith.constant 0 : index
      %69 = vector.load %arg4[%c0_27, %c0_28, %c0_29] : memref<1x8x128xf32, #tpu.memory_space<vmem>>, vector<1x8x128xf32>
      tpu.vector_store %arg4[%c0_27, %c0_28, %c0_29], %68 {strides = array<i32>} : memref<1x8x128xf32, #tpu.memory_space<vmem>>, vector<1x8x128xf32>,
    } else {
    }
    return
  }
  func.func @transform_0(%arg0: i32, %arg1: i32) -> (i32, i32) {
    %c1_i32 = arith.constant 1 : i32
    %0 = arith.muli %arg0, %c1_i32 : i32
    %1 = arith.addi %0, %arg1 : i32
    %c0_i32 = arith.constant 0 : i32
    %2 = arith.minsi %1, %c0_i32 : i32
    %c0_i32_0 = arith.constant 0 : i32
    %c0_i32_1 = arith.constant 0 : i32
    return %2, %c0_i32_0 : i32, i32
  }
  func.func @transform_1(%arg0: i32, %arg1: i32) -> (i32, i32) {
    %c1_i32 = arith.constant 1 : i32
    %0 = arith.muli %arg0, %c1_i32 : i32
    %1 = arith.addi %0, %arg1 : i32
    %c0_i32 = arith.constant 0 : i32
    %2 = arith.minsi %1, %c0_i32 : i32
    %c0_i32_0 = arith.constant 0 : i32
    %c0_i32_1 = arith.constant 0 : i32
    return %2, %c0_i32_0 : i32, i32
  }
  func.func @transform_2(%arg0: i32, %arg1: i32) -> (i32, i32, i32) {
    %c0_i32 = arith.constant 0 : i32
    %c0_i32_0 = arith.constant 0 : i32
    %c0_i32_1 = arith.constant 0 : i32
    return %arg0, %c0_i32, %c0_i32_0 : i32, i32, i32
  }
}

</mosaic_0001>

<bundles_post_ra>
// kernel: tpu_custom_call.1
= control target key start
LH: loop header
LB: loop body
LE: loop exit
PB: predicated region body
PF: predicated region fallthrough
CT: control target
= control target key end

     0   :  { %vm88_vm0 = vcmask 261120   ;;  %s254_s0 = inlined_call_operand.vmem [shape: f32[8,32], index: 0, kind: input, shape index: {}]   ;;  %s255_s1 = inlined_call_operand.vmem [shape: s32[8,1], index: 1, kind: input, shape index: {}]   ;;  %s256_s2 = inlined_call_operand.hbm [shape: f32[1,8,128], index: 2, kind: output, shape index: {}]  }
   0x1   :  { %v72_v0 = vld [vmem:[%s254_s0] sm:$0xff] }
   0x2   :  { %7 = vsyncpa [#allocation4], 0  ;;  %v92_v1 = vmul.f32 %v72_v0, %v72_v0  ;;  %v213_v2 = vmov 0   ;;  %v73_v4 = vld [vmem:[%s255_s1] sm:$0xff]  ;;  %v81_v10 = vlaneseq  ;;  %vm70_vm2 = vcmask 0   ;;  %s215_s0 = smov [#allocation3]  }
   0x3   :  { %177 = vset.pattern.permute.xlu0 %v213_v2  ;;  %178 = vset.pattern.permute.xlu1 %v213_v2  ;;  %v214_v17 = vmov 0.0   ;;  %s153_s1 = sshll.u32 %s215_s0, 4  ;;  %s154_s1 = int_to_ptr.vmem [resolvable:$true] %s153_s1 }
   0x4   :  { %v93_v3 = vsel %vm88_vm0, %v92_v1, 0.0  ;;  %v82_v11 = vand.u32 127, %v81_v10  ;;  %71 = vst.msk [vmem:[#allocation2] sm:$0x1] %vm70_vm2, %v214_v17  ;;  %s189_s13 = scalar_lea.vmem %s154_s1, 128  ;;  %p194_p1 = scmp.lt.s32.totalorder %s154_s1, %s154_s1 }
   0x5   :  { %94 = vadd.xlane.f32.xlu0 %v93_v3  ;;  %p190_p0 = scmp.ne.s32.totalorder %s154_s1, %s189_s13  ;;  %p195_p2 = scmp.lt.s32.totalorder %s189_s13, %s189_s13 }
   0x7   :  { %p196_p3 = por %p195_p2, %p194_p1 }
   0x9   :  { %p197_p4 = pnand %p196_p3, %p190_p0 }
   0xb   :  { %v122_v42 = vld [vmem:[#allocation2] sm:$0x1] }
  0x1b   :  { %84 = vperm.xlu0 %177, %v73_v4  }
  0x92   :  { %v95_v5 = vpop.xlane.xlu0 %94 }
  0x93   :  { %v100_v6 = vmax.f32 %v95_v5, 1e-24  ;;  %v96_v26 = vadd.f32 1e-12, %v95_v5 }
  0x95   :  { %179 = vrsqrt.f32 %v100_v6 }
  0x9a   :  { %v85_v12 = vpop.permute.xlu0 %84 }
  0x9b   :  { %vm86_vm1 = vcmp.eq.s32.totalorder %v82_v11, %v85_v12 }
  0x9c   :  { %v87_v14 = vsel %vm86_vm1, %v72_v0, 0.0 }
  0x9d   :  { %v89_v16 = vsel %vm88_vm0, %v87_v14, 0.0 }
  0x9f   :  { %v180_v7 = vpop.eup %179 }
  0xa0   :  { %v102_v8 = vmul.f32 %v180_v7, %v72_v0 }
  0xa2   :  { %v103_v9 = vmul.f32 1.442695, %v102_v8 }
  0xa4   :  { %181 = vpow2.f32 %v103_v9 }
  0xae   :  { %v182_v13 = vpop.eup %181 }
  0xaf   :  { %v105_v15 = vsel %vm88_vm0, %v182_v13, 0.0 }
  0xb0   :  { %106 = vadd.xlane.f32.xlu1 %v105_v15 }
  0xb4   :  { %90 = vadd.xlane.f32.xlu1 %v89_v16 }
 0x13d   :  { %v107_v18 = vpop.xlane.xlu1 %106 }
 0x13e   :  { %183 = vlog2.f32 %v107_v18 }
 0x141   :  { %v91_v19 = vpop.xlane.xlu1 %90 }
 0x142   :  { %v110_v22 = vmul.f32 %v180_v7, %v91_v19 }
 0x148   :  { %v184_v20 = vpop.eup %183 }
 0x149   :  { %v109_v21 = vmul.f32 0.6931472, %v184_v20 }
 0x14b   :  { %v111_v23 = vsub.f32 %v109_v21, %v110_v22 }
 0x14d   :  { %v112_v24 = vsub.f32 0.0, %v111_v23 }
 0x14f   :  { %v113_v25 = vmul.f32 1.442695, %v112_v24 }
 0x151   :  { %185 = vpow2.f32 %v113_v25 }
 0x152   :  { %187 = vrsqrt.f32 %v96_v26 }
 0x15b   :  { %v186_v27 = vpop.eup %185 }
 0x15c   :  { %v115_v28 = vsub.f32 1.0, %v186_v27  ;;  %v188_v30 = vpop.eup %187 }
 0x15d   :  { %v98_v31 = vmul.f32 %v188_v30, %v91_v19 }
 0x15e   :  { %v116_v29 = vmax.f32 %v115_v28, 0.0 }
 0x15f   :  { %v99_v34 = vsub.f32 1.0, %v98_v31 }
 0x160   :  { %v117_v32 = vmul.f32 %v116_v29, %v116_v29 }
 0x162   :  { %v118_v33 = vmul.f32 0.1, %v117_v32 }
 0x164   :  { %v119_v35 = vmul.f32 %v118_v33, %v111_v23 }
 0x166   :  { %v120_v36 = vadd.f32 %v119_v35, %v99_v34 }
 0x168   :  { %v123_v37 = vrot.slane %v120_v36, 4 }
 0x16a   :  { %v124_v38 = vadd.f32 %v123_v37, %v120_v36 }
 0x16c   :  { %v125_v39 = vrot.slane %v124_v38, 2 }
 0x16e   :  { %v126_v40 = vadd.f32 %v125_v39, %v124_v38 }
 0x170   :  { %v127_v41 = vrot.slane %v126_v40, 1 }
 0x172   :  { %v128_v43 = vadd.f32 %v127_v41, %v126_v40 }
 0x174   :  { %v129_v44 = vadd.f32 %v128_v43, %v122_v42 }
 0x176   :  { %131 = vst.msk [vmem:[#allocation2] sm:$0x1] %vm70_vm2, %v129_v44 }
 0x17d   :  { %v173_v45 = vld [vmem:[#allocation2] ss:$0 sm:$0xff] }
 0x17e   :  { %142 = vperm.xlu1 %178, %v173_v45  }
 0x1fd   :  { %v143_v46 = vpop.permute.xlu1 %142 }
 0x1fe   :  { %146 = vst [vmem:[#allocation3] sm:$0xff] %v143_v46 }
 0x1ff   :  { %200 = shalt.err (!%p197_p4)
}
 0x200   :  { %s201_s16 = scalar_lea.hbm %s256_s2, 128 }
 0x201   :  { %p202_p5 = scmp.ne.s32.totalorder %s256_s2, %s201_s16  ;;  %p205_p6 = scmp.lt.u32.totalorder %s201_s16, %s256_s2 }
 0x203   :  { %p207_p7 = pnand %p205_p6, %p202_p5 }
 0x205   :  { %210 = shalt.err (!%p207_p7)
}
 0x206   :  { %156 = dma.vmem_to_hbm [thread:$0]  %s154_s1, 128, %s256_s2, [#allocation4]  }
 0x207   :  { %211 = dma.done.wait [#allocation4], 128  }
 0x208   :  { %212 = vsyncadd [#allocation4], 4294967168 }
 0x209   :  { %160 = vsyncpa [#allocation4], 1 }

</bundles_post_ra>
